<compile_context>
chip_gen: v5e
topology: v5e:2x2
jax: 0.10.0
libtpu: 0.0.40
codegen_flags: <defaults>
</compile_context>

<pallas_src>
import functools
import math

import jax
import jax.numpy as jnp
from jax import lax
from jax.experimental import pallas as pl
from jax.experimental.pallas import tpu as pltpu


def _csa_kernel(mask_ref, x_ref, wqkv_ref, wproj_ref, o_ref, qkv_ref, y_ref,
                *, n_head, seq_len, batch_block):
    # mask_ref:  (T, T)      additive causal mask, f32 (invariant input)
    # x_ref:     (Bb*T, C)   row slab covering `batch_block` full sequences
    # wqkv_ref:  (C, 3C)     fused QKV weight, (in, out) layout (invariant)
    # wproj_ref: (C, C)      output projection weight, (in, out) (invariant)
    # o_ref:     (Bb*T, C)
    # qkv_ref:   (Bb*T, 3C)  VMEM scratch, compute dtype (staged QKV)
    # y_ref:     (Bb*T, C)   VMEM scratch, compute dtype (staged attn output)
    T = seq_len
    rows, C = x_ref.shape
    H = n_head
    Dh = C // H
    scale = 1.0 / math.sqrt(Dh)

    # --- fused QKV projection over all rows (MXU, f32 accumulation), staged
    # through VMEM so per-head slices below are plain loads, not value slices
    # of a huge live tensor. ---
    qkv_ref[...] = jnp.dot(
        x_ref[...], wqkv_ref[...],
        preferred_element_type=jnp.float32).astype(qkv_ref.dtype)

    mask_add = mask_ref[...]                       # (T, T) f32, loaded once

    def per_seq(b, carry):
        r0 = b * T
        if not isinstance(r0, int) and T % 8 == 0:
            r0 = pl.multiple_of(r0, 8)             # aligned sublane offset hint
        head_outs = []
        for h in range(H):                         # H is small; static slices
            c0 = h * Dh
            q_h = qkv_ref[pl.ds(r0, T), 0 * C + c0:0 * C + c0 + Dh]   # (T, Dh)
            k_h = qkv_ref[pl.ds(r0, T), 1 * C + c0:1 * C + c0 + Dh]   # (T, Dh)
            v_h = qkv_ref[pl.ds(r0, T), 2 * C + c0:2 * C + c0 + Dh]   # (T, Dh)

            # scores = q @ k^T as an NT dot_general (no explicit transpose).
            # TODO(synk): if the bundle dump shows per-head vxpose here, stage
            # K pre-transposed as (Dh, T) in the qkv scratch instead.
            att = lax.dot_general(q_h, k_h, (((1,), (1,)), ((), ())),
                                  preferred_element_type=jnp.float32)  # (T, T)
            att = att * scale + mask_add

            # numerically stable softmax, f32; EUP approximate reciprocal.
            m = jnp.max(att, axis=-1, keepdims=True)
            p = jnp.exp(att - m)
            denom = jnp.sum(p, axis=-1, keepdims=True)
            p = p * pl.reciprocal(denom, approx=True)

            # y_h = p @ v (probabilities cast back to the value dtype).
            y_h = jnp.dot(p.astype(v_h.dtype), v_h,
                          preferred_element_type=jnp.float32)          # (T, Dh)
            head_outs.append(y_h)

        # Single lane-dense (T, C) store per sequence instead of H masked
        # Dh-wide partial stores.
        y_seq = jnp.concatenate(head_outs, axis=-1)                    # (T, C)
        y_ref[pl.ds(r0, T), :] = y_seq.astype(y_ref.dtype)
        return carry

    if batch_block == 1:
        per_seq(0, 0)
    else:
        lax.fori_loop(0, batch_block, per_seq, 0,
                      unroll=min(batch_block, 2))

    # --- output projection over all rows (MXU, f32 accumulation) ---
    o_ref[...] = jnp.dot(y_ref[...], wproj_ref[...],
                         preferred_element_type=jnp.float32).astype(o_ref.dtype)


def _pick_batch_block(B, T, target_rows=512, max_rows=1024):
    """Largest divisor of B whose row slab stays <= max_rows (stop once the
    ~target_rows MXU-feeding size is reached), preferring >= 2 grid steps so
    both v7x TensorCores and the software pipeline get work.  Row counts stay
    divisible by 8 unless the slab is full-extent."""
    candidates = []
    for d in range(1, B + 1):
        if B % d:
            continue
        rows = d * T
        if d < B and rows % 8 != 0:
            continue                      # (8, 128) tiling on the row dim
        if d > 1 and rows > max_rows:
            continue
        candidates.append(d)
    if not candidates:
        return B
    multi = [d for d in candidates if B // d >= 2]
    pool = multi if multi else candidates
    best = pool[0]
    for d in pool:                        # ascending
        best = d
        if d * T >= target_rows:
            break
    return best


def _vmem_limit_bytes(rows, T, C, act_itemsize):
    """Scoped-VMEM limit sized from the actual buffers (double-buffered
    x/out slabs + weights + mask, plus the two staging scratches), with
    headroom for score tiles and compiler temporaries."""
    x_slab = rows * C * act_itemsize
    o_slab = rows * C * act_itemsize
    weights = (C * 3 * C + C * C) * act_itemsize
    mask = T * T * 4
    qkv_scratch = rows * 3 * C * act_itemsize
    y_scratch = rows * C * act_itemsize
    est = 2 * (x_slab + o_slab + weights + mask) + qkv_scratch + y_scratch
    est = int(est * 1.5) + T * T * 4 + (2 << 20)
    return max(16 << 20, min(est, 64 << 20))


def causal_self_attention(x, w_attn, w_proj, n_head):
    """x: (B, T, C); w_attn: (3C, C) torch nn.Linear layout; w_proj: (C, C)."""
    B, T, C = x.shape
    assert C % n_head == 0
    H, Dh = n_head, C // n_head

    # Transpose once in the wrapper so the kernel does plain x @ W matmuls.
    wqkv_t = jnp.asarray(w_attn).T                 # (C, 3C)
    wproj_t = jnp.asarray(w_proj).T                # (C, C)

    # Additive causal mask, precomputed once and passed as an invariant input.
    row_id = lax.broadcasted_iota(jnp.int32, (T, T), 0)
    col_id = lax.broadcasted_iota(jnp.int32, (T, T), 1)
    mask_add = jnp.where(col_id <= row_id, 0.0, -jnp.inf).astype(jnp.float32)

    Bb = _pick_batch_block(B, T)
    rows = Bb * T
    grid_steps = B // Bb
    x2 = x.reshape(B * T, C)
    compute_dtype = x.dtype

    act_sz = x.dtype.itemsize
    w_sz = wqkv_t.dtype.itemsize
    cost = pl.CostEstimate(
        flops=2 * B * T * C * (3 * C)              # QKV projection
        + 4 * B * H * T * T * Dh                   # q@k^T and p@v
        + 2 * B * T * C * C,                       # output projection
        transcendentals=B * H * T * T,             # softmax exp
        bytes_accessed=2 * B * T * C * act_sz      # x in + out
        + (3 * C * C + C * C) * w_sz               # weights
        + T * T * 4,                               # mask
    )

    kernel = functools.partial(_csa_kernel, n_head=n_head, seq_len=T,
                               batch_block=Bb)

    out2 = pl.pallas_call(
        kernel,
        out_shape=jax.ShapeDtypeStruct((B * T, C), x.dtype),
        grid_spec=pltpu.PrefetchScalarGridSpec(
            num_scalar_prefetch=0,
            grid=(grid_steps,),
            in_specs=[
                pl.BlockSpec((T, T), lambda i: (0, 0)),         # causal mask
                pl.BlockSpec((rows, C), lambda i: (i, 0)),      # x row slab
                pl.BlockSpec((C, 3 * C), lambda i: (0, 0)),     # wqkv (invariant)
                pl.BlockSpec((C, C), lambda i: (0, 0)),         # wproj (invariant)
            ],
            out_specs=pl.BlockSpec((rows, C), lambda i: (i, 0)),
            scratch_shapes=[
                pltpu.VMEM((rows, 3 * C), compute_dtype),       # staged qkv
                pltpu.VMEM((rows, C), compute_dtype),           # staged attn out
            ],
        ),
        compiler_params=pltpu.CompilerParams(
            dimension_semantics=("parallel",),
            vmem_limit_bytes=_vmem_limit_bytes(rows, T, C, act_sz),
        ),
        cost_estimate=cost,
    )(mask_add, x2, wqkv_t, wproj_t)

    return out2.reshape(B, T, C)


def _reference(x, w_attn, w_proj, n_head):
    """Pure-JAX reference mirroring the PyTorch forward (f32)."""
    B, T, C = x.shape
    H, Dh = n_head, C // n_head
    qkv = jnp.einsum('btc,oc->bto', x, w_attn)                 # Linear: x @ W^T
    q, k, v = jnp.split(qkv, 3, axis=2)
    q = q.reshape(B, T, H, Dh).transpose(0, 2, 1, 3)
    k = k.reshape(B, T, H, Dh).transpose(0, 2, 1, 3)
    v = v.reshape(B, T, H, Dh).transpose(0, 2, 1, 3)
    att = (q @ jnp.swapaxes(k, -2, -1)) * (1.0 / math.sqrt(Dh))
    mask = jnp.tril(jnp.ones((T, T)))[None, None]
    att = jnp.where(mask == 0, -jnp.inf, att)
    att = jax.nn.softmax(att, axis=-1)
    y = (att @ v).transpose(0, 2, 1, 3).reshape(B, T, C)
    return jnp.einsum('btc,oc->bto', y, w_proj)


if __name__ == "__main__":
    # Small shapes consistent with the module: B=2, T=8, C=32, n_head=4.
    B, T, C, n_head = 2, 8, 32, 4

    key = jax.random.PRNGKey(0)
    kx, kw1, kw2 = jax.random.split(key, 3)
    x = jax.random.normal(kx, (B, T, C), dtype=jnp.float32)
    # nn.Linear weight shapes: (out_features, in_features), bias=False.
    w_attn = jax.random.normal(kw1, (3 * C, C), dtype=jnp.float32) * (1.0 / math.sqrt(C))
    w_proj = jax.random.normal(kw2, (C, C), dtype=jnp.float32) * (1.0 / math.sqrt(C))

    ref = _reference(x, w_attn, w_proj, n_head)

    # f32 path (tolerance accommodates the EUP approximate reciprocal).
    out = causal_self_attention(x, w_attn, w_proj, n_head)
    out = jax.block_until_ready(out)
    assert out.shape == (B, T, C)
    assert jnp.allclose(out, ref, atol=2e-2, rtol=2e-2), "f32 mismatch vs reference"

    # bf16 path: operands stay bf16 on the MXU with f32 accumulation.
    out_bf16 = causal_self_attention(x.astype(jnp.bfloat16),
                                     w_attn.astype(jnp.bfloat16),
                                     w_proj.astype(jnp.bfloat16), n_head)
    out_bf16 = jax.block_until_ready(out_bf16)
    assert out_bf16.shape == (B, T, C)
    assert jnp.allclose(out_bf16.astype(jnp.float32), ref, atol=0.2, rtol=0.2), \
        "bf16 mismatch vs reference"

    print("KERNEL_OK")
</pallas_src>

<mosaic_0001>
module attributes {stable_mosaic.version = 11 : i64} {
  func.func @_csa_kernel(%arg0: i32, %arg1: memref<8x8xf32, #tpu.memory_space<vmem>>, %arg2: memref<8x32xf32, #tpu.memory_space<vmem>>, %arg3: memref<32x96xf32, #tpu.memory_space<vmem>>, %arg4: memref<32x32xf32, #tpu.memory_space<vmem>>, %arg5: memref<8x32xf32, #tpu.memory_space<vmem>>, %arg6: memref<8x96xf32, #tpu.memory_space<vmem>>, %arg7: memref<8x32xf32, #tpu.memory_space<vmem>>) attributes {dimension_semantics = [#tpu.dimension_semantics<parallel>], iteration_bounds = array<i64: 2>, scalar_prefetch = 0 : i64, scratch_operands = 2 : i64, tpu.core_type = #tpu.core_type<tc>, window_params = [{pipeline_mode = #tpu.pipeline_mode<synchronous>, transform_indices = @transform_0, window_bounds = array<i64: 8, 8>}, {transform_indices = @transform_1, window_bounds = array<i64: 8, 32>}, {pipeline_mode = #tpu.pipeline_mode<synchronous>, transform_indices = @transform_2, window_bounds = array<i64: 32, 96>}, {pipeline_mode = #tpu.pipeline_mode<synchronous>, transform_indices = @transform_3, window_bounds = array<i64: 32, 32>}, {transform_indices = @transform_4, window_bounds = array<i64: 8, 32>}]} {
    %c0 = arith.constant 0 : index
    %c0_0 = arith.constant 0 : index
    %0 = vector.load %arg2[%c0, %c0_0] : memref<8x32xf32, #tpu.memory_space<vmem>>, vector<8x32xf32>
    %c0_1 = arith.constant 0 : index
    %c0_2 = arith.constant 0 : index
    %1 = vector.load %arg3[%c0_1, %c0_2] : memref<32x96xf32, #tpu.memory_space<vmem>>, vector<32x96xf32>
    %cst = arith.constant dense<0.000000e+00> : vector<8x96xf32>
    %2 = tpu.matmul %0, %1, %cst {dimension_numbers = #tpu.dot_dimension_numbers<[1], [0], [0], [1], [0, 0, 1, 1], [], []>} : vector<8x32xf32>, vector<32x96xf32>, vector<8x96xf32> -> vector<8x96xf32>
    %c0_3 = arith.constant 0 : index
    %c0_4 = arith.constant 0 : index
    %3 = vector.load %arg6[%c0_3, %c0_4] : memref<8x96xf32, #tpu.memory_space<vmem>>, vector<8x96xf32>
    tpu.vector_store %arg6[%c0_3, %c0_4], %2 {strides = array<i32>} : memref<8x96xf32, #tpu.memory_space<vmem>>, vector<8x96xf32>,
    %c0_5 = arith.constant 0 : index
    %c0_6 = arith.constant 0 : index
    %4 = vector.load %arg1[%c0_5, %c0_6] : memref<8x8xf32, #tpu.memory_space<vmem>>, vector<8x8xf32>
    %c0_7 = arith.constant 0 : index
    %c0_8 = arith.constant 0 : index
    %5 = vector.load %arg6[%c0_7, %c0_8] : memref<8x96xf32, #tpu.memory_space<vmem>>, vector<8x8xf32>
    %c0_9 = arith.constant 0 : index
    %c32 = arith.constant 32 : index
    %6 = vector.load %arg6[%c0_9, %c32] : memref<8x96xf32, #tpu.memory_space<vmem>>, vector<8x8xf32>
    %c0_10 = arith.constant 0 : index
    %c64 = arith.constant 64 : index
    %7 = vector.load %arg6[%c0_10, %c64] : memref<8x96xf32, #tpu.memory_space<vmem>>, vector<8x8xf32>
    %cst_11 = arith.constant dense<0.000000e+00> : vector<8x8xf32>
    %8 = tpu.matmul %5, %6, %cst_11 {dimension_numbers = #tpu.dot_dimension_numbers<[1], [1], [0], [0], [0, 0, 1, 0], [], []>} : vector<8x8xf32>, vector<8x8xf32>, vector<8x8xf32> -> vector<8x8xf32>
    %cst_12 = arith.constant 0.353553385 : f32
    %9 = vector.broadcast %cst_12 : f32 to vector<8x8xf32>
    %10 = arith.mulf %8, %9 : vector<8x8xf32>
    %11 = arith.addf %10, %4 : vector<8x8xf32>
    %cst_13 = arith.constant dense<0xFF800000> : vector<8xf32>
    %12 = vector.multi_reduction <maximumf>, %11, %cst_13 [1] : vector<8x8xf32> to vector<8xf32>
    %13 = vector.shape_cast %12 : vector<8xf32> to vector<8x1xf32>
    %14 = vector.broadcast %13 : vector<8x1xf32> to vector<8x8xf32>
    %15 = arith.subf %11, %14 : vector<8x8xf32>
    %16 = math.exp %15 : vector<8x8xf32>
    %cst_14 = arith.constant dense<0.000000e+00> : vector<8xf32>
    %17 = vector.multi_reduction <add>, %16, %cst_14 [1] : vector<8x8xf32> to vector<8xf32>
    %18 = vector.shape_cast %17 : vector<8xf32> to vector<8x1xf32>
    %19 = tpu.reciprocal %18 {approx = true} : vector<8x1xf32> -> vector<8x1xf32>
    %20 = vector.broadcast %19 : vector<8x1xf32> to vector<8x8xf32>
    %21 = arith.mulf %16, %20 : vector<8x8xf32>
    %cst_15 = arith.constant dense<0.000000e+00> : vector<8x8xf32>
    %22 = tpu.matmul %21, %7, %cst_15 {dimension_numbers = #tpu.dot_dimension_numbers<[1], [0], [0], [1], [0, 0, 1, 1], [], []>} : vector<8x8xf32>, vector<8x8xf32>, vector<8x8xf32> -> vector<8x8xf32>
    %c0_16 = arith.constant 0 : index
    %c8 = arith.constant 8 : index
    %23 = vector.load %arg6[%c0_16, %c8] : memref<8x96xf32, #tpu.memory_space<vmem>>, vector<8x8xf32>
    %c0_17 = arith.constant 0 : index
    %c40 = arith.constant 40 : index
    %24 = vector.load %arg6[%c0_17, %c40] : memref<8x96xf32, #tpu.memory_space<vmem>>, vector<8x8xf32>
    %c0_18 = arith.constant 0 : index
    %c72 = arith.constant 72 : index
    %25 = vector.load %arg6[%c0_18, %c72] : memref<8x96xf32, #tpu.memory_space<vmem>>, vector<8x8xf32>
    %cst_19 = arith.constant dense<0.000000e+00> : vector<8x8xf32>
    %26 = tpu.matmul %23, %24, %cst_19 {dimension_numbers = #tpu.dot_dimension_numbers<[1], [1], [0], [0], [0, 0, 1, 0], [], []>} : vector<8x8xf32>, vector<8x8xf32>, vector<8x8xf32> -> vector<8x8xf32>
    %cst_20 = arith.constant 0.353553385 : f32
    %27 = vector.broadcast %cst_20 : f32 to vector<8x8xf32>
    %28 = arith.mulf %26, %27 : vector<8x8xf32>
    %29 = arith.addf %28, %4 : vector<8x8xf32>
    %cst_21 = arith.constant dense<0xFF800000> : vector<8xf32>
    %30 = vector.multi_reduction <maximumf>, %29, %cst_21 [1] : vector<8x8xf32> to vector<8xf32>
    %31 = vector.shape_cast %30 : vector<8xf32> to vector<8x1xf32>
    %32 = vector.broadcast %31 : vector<8x1xf32> to vector<8x8xf32>
    %33 = arith.subf %29, %32 : vector<8x8xf32>
    %34 = math.exp %33 : vector<8x8xf32>
    %cst_22 = arith.constant dense<0.000000e+00> : vector<8xf32>
    %35 = vector.multi_reduction <add>, %34, %cst_22 [1] : vector<8x8xf32> to vector<8xf32>
    %36 = vector.shape_cast %35 : vector<8xf32> to vector<8x1xf32>
    %37 = tpu.reciprocal %36 {approx = true} : vector<8x1xf32> -> vector<8x1xf32>
    %38 = vector.broadcast %37 : vector<8x1xf32> to vector<8x8xf32>
    %39 = arith.mulf %34, %38 : vector<8x8xf32>
    %cst_23 = arith.constant dense<0.000000e+00> : vector<8x8xf32>
    %40 = tpu.matmul %39, %25, %cst_23 {dimension_numbers = #tpu.dot_dimension_numbers<[1], [0], [0], [1], [0, 0, 1, 1], [], []>} : vector<8x8xf32>, vector<8x8xf32>, vector<8x8xf32> -> vector<8x8xf32>
    %c0_24 = arith.constant 0 : index
    %c16 = arith.constant 16 : index
    %41 = vector.load %arg6[%c0_24, %c16] : memref<8x96xf32, #tpu.memory_space<vmem>>, vector<8x8xf32>
    %c0_25 = arith.constant 0 : index
    %c48 = arith.constant 48 : index
    %42 = vector.load %arg6[%c0_25, %c48] : memref<8x96xf32, #tpu.memory_space<vmem>>, vector<8x8xf32>
    %c0_26 = arith.constant 0 : index
    %c80 = arith.constant 80 : index
    %43 = vector.load %arg6[%c0_26, %c80] : memref<8x96xf32, #tpu.memory_space<vmem>>, vector<8x8xf32>
    %cst_27 = arith.constant dense<0.000000e+00> : vector<8x8xf32>
    %44 = tpu.matmul %41, %42, %cst_27 {dimension_numbers = #tpu.dot_dimension_numbers<[1], [1], [0], [0], [0, 0, 1, 0], [], []>} : vector<8x8xf32>, vector<8x8xf32>, vector<8x8xf32> -> vector<8x8xf32>
    %cst_28 = arith.constant 0.353553385 : f32
    %45 = vector.broadcast %cst_28 : f32 to vector<8x8xf32>
    %46 = arith.mulf %44, %45 : vector<8x8xf32>
    %47 = arith.addf %46, %4 : vector<8x8xf32>
    %cst_29 = arith.constant dense<0xFF800000> : vector<8xf32>
    %48 = vector.multi_reduction <maximumf>, %47, %cst_29 [1] : vector<8x8xf32> to vector<8xf32>
    %49 = vector.shape_cast %48 : vector<8xf32> to vector<8x1xf32>
    %50 = vector.broadcast %49 : vector<8x1xf32> to vector<8x8xf32>
    %51 = arith.subf %47, %50 : vector<8x8xf32>
    %52 = math.exp %51 : vector<8x8xf32>
    %cst_30 = arith.constant dense<0.000000e+00> : vector<8xf32>
    %53 = vector.multi_reduction <add>, %52, %cst_30 [1] : vector<8x8xf32> to vector<8xf32>
    %54 = vector.shape_cast %53 : vector<8xf32> to vector<8x1xf32>
    %55 = tpu.reciprocal %54 {approx = true} : vector<8x1xf32> -> vector<8x1xf32>
    %56 = vector.broadcast %55 : vector<8x1xf32> to vector<8x8xf32>
    %57 = arith.mulf %52, %56 : vector<8x8xf32>
    %cst_31 = arith.constant dense<0.000000e+00> : vector<8x8xf32>
    %58 = tpu.matmul %57, %43, %cst_31 {dimension_numbers = #tpu.dot_dimension_numbers<[1], [0], [0], [1], [0, 0, 1, 1], [], []>} : vector<8x8xf32>, vector<8x8xf32>, vector<8x8xf32> -> vector<8x8xf32>
    %c0_32 = arith.constant 0 : index
    %c24 = arith.constant 24 : index
    %59 = vector.load %arg6[%c0_32, %c24] : memref<8x96xf32, #tpu.memory_space<vmem>>, vector<8x8xf32>
    %c0_33 = arith.constant 0 : index
    %c56 = arith.constant 56 : index
    %60 = vector.load %arg6[%c0_33, %c56] : memref<8x96xf32, #tpu.memory_space<vmem>>, vector<8x8xf32>
    %c0_34 = arith.constant 0 : index
    %c88 = arith.constant 88 : index
    %61 = vector.load %arg6[%c0_34, %c88] : memref<8x96xf32, #tpu.memory_space<vmem>>, vector<8x8xf32>
    %cst_35 = arith.constant dense<0.000000e+00> : vector<8x8xf32>
    %62 = tpu.matmul %59, %60, %cst_35 {dimension_numbers = #tpu.dot_dimension_numbers<[1], [1], [0], [0], [0, 0, 1, 0], [], []>} : vector<8x8xf32>, vector<8x8xf32>, vector<8x8xf32> -> vector<8x8xf32>
    %cst_36 = arith.constant 0.353553385 : f32
    %63 = vector.broadcast %cst_36 : f32 to vector<8x8xf32>
    %64 = arith.mulf %62, %63 : vector<8x8xf32>
    %65 = arith.addf %64, %4 : vector<8x8xf32>
    %cst_37 = arith.constant dense<0xFF800000> : vector<8xf32>
    %66 = vector.multi_reduction <maximumf>, %65, %cst_37 [1] : vector<8x8xf32> to vector<8xf32>
    %67 = vector.shape_cast %66 : vector<8xf32> to vector<8x1xf32>
    %68 = vector.broadcast %67 : vector<8x1xf32> to vector<8x8xf32>
    %69 = arith.subf %65, %68 : vector<8x8xf32>
    %70 = math.exp %69 : vector<8x8xf32>
    %cst_38 = arith.constant dense<0.000000e+00> : vector<8xf32>
    %71 = vector.multi_reduction <add>, %70, %cst_38 [1] : vector<8x8xf32> to vector<8xf32>
    %72 = vector.shape_cast %71 : vector<8xf32> to vector<8x1xf32>
    %73 = tpu.reciprocal %72 {approx = true} : vector<8x1xf32> -> vector<8x1xf32>
    %74 = vector.broadcast %73 : vector<8x1xf32> to vector<8x8xf32>
    %75 = arith.mulf %70, %74 : vector<8x8xf32>
    %cst_39 = arith.constant dense<0.000000e+00> : vector<8x8xf32>
    %76 = tpu.matmul %75, %61, %cst_39 {dimension_numbers = #tpu.dot_dimension_numbers<[1], [0], [0], [1], [0, 0, 1, 1], [], []>} : vector<8x8xf32>, vector<8x8xf32>, vector<8x8xf32> -> vector<8x8xf32>
    %77 = tpu.concatenate %22, %40, %58, %76 in 1 : vector<8x8xf32>, vector<8x8xf32>, vector<8x8xf32>, vector<8x8xf32> -> vector<8x32xf32>
    %c0_40 = arith.constant 0 : index
    %c0_41 = arith.constant 0 : index
    %78 = vector.load %arg7[%c0_40, %c0_41] : memref<8x32xf32, #tpu.memory_space<vmem>>, vector<8x32xf32>
    tpu.vector_store %arg7[%c0_40, %c0_41], %77 {strides = array<i32>} : memref<8x32xf32, #tpu.memory_space<vmem>>, vector<8x32xf32>,
    %c0_42 = arith.constant 0 : index
    %c0_43 = arith.constant 0 : index
    %79 = vector.load %arg7[%c0_42, %c0_43] : memref<8x32xf32, #tpu.memory_space<vmem>>, vector<8x32xf32>
    %c0_44 = arith.constant 0 : index
    %c0_45 = arith.constant 0 : index
    %80 = vector.load %arg4[%c0_44, %c0_45] : memref<32x32xf32, #tpu.memory_space<vmem>>, vector<32x32xf32>
    %cst_46 = arith.constant dense<0.000000e+00> : vector<8x32xf32>
    %81 = tpu.matmul %79, %80, %cst_46 {dimension_numbers = #tpu.dot_dimension_numbers<[1], [0], [0], [1], [0, 0, 1, 1], [], []>} : vector<8x32xf32>, vector<32x32xf32>, vector<8x32xf32> -> vector<8x32xf32>
    %c0_47 = arith.constant 0 : index
    %c0_48 = arith.constant 0 : index
    %82 = vector.load %arg5[%c0_47, %c0_48] : memref<8x32xf32, #tpu.memory_space<vmem>>, vector<8x32xf32>
    tpu.vector_store %arg5[%c0_47, %c0_48], %81 {strides = array<i32>} : memref<8x32xf32, #tpu.memory_space<vmem>>, vector<8x32xf32>,
    return
  }
  func.func @transform_0(%arg0: i32) -> (i32, i32) {
    %c0_i32 = arith.constant 0 : i32
    %c0_i32_0 = arith.constant 0 : i32
    %c0_i32_1 = arith.constant 0 : i32
    return %c0_i32, %c0_i32_0 : i32, i32
  }
  func.func @transform_1(%arg0: i32) -> (i32, i32) {
    %c0_i32 = arith.constant 0 : i32
    %c0_i32_0 = arith.constant 0 : i32
    return %arg0, %c0_i32 : i32, i32
  }
  func.func @transform_2(%arg0: i32) -> (i32, i32) {
    %c0_i32 = arith.constant 0 : i32
    %c0_i32_0 = arith.constant 0 : i32
    %c0_i32_1 = arith.constant 0 : i32
    return %c0_i32, %c0_i32_0 : i32, i32
  }
  func.func @transform_3(%arg0: i32) -> (i32, i32) {
    %c0_i32 = arith.constant 0 : i32
    %c0_i32_0 = arith.constant 0 : i32
    %c0_i32_1 = arith.constant 0 : i32
    return %c0_i32, %c0_i32_0 : i32, i32
  }
  func.func @transform_4(%arg0: i32) -> (i32, i32) {
    %c0_i32 = arith.constant 0 : i32
    %c0_i32_0 = arith.constant 0 : i32
    return %arg0, %c0_i32 : i32, i32
  }
}

</mosaic_0001>

<bundles_post_ra>
// kernel: tpu_custom_call.1
= control target key start
LH: loop header
LB: loop body
LE: loop exit
PB: predicated region body
PF: predicated region fallthrough
CT: control target
= control target key end

     0   :  { %9 = vsyncpa [#allocation5], 0  ;;  %s1325_s0 = inlined_call_operand.hbm [shape: f32[8,8], index: 0, kind: input, shape index: {}]   ;;  %s1326_s1 = inlined_call_operand.hbm [shape: f32[16,32], index: 1, kind: input, shape index: {}]   ;;  %s1327_s2 = inlined_call_operand.hbm [shape: f32[32,96], index: 2, kind: input, shape index: {}]   ;;  %s1328_s3 = inlined_call_operand.hbm [shape: f32[32,32], index: 3, kind: input, shape index: {}]   ;;  %s1329_s4 = inlined_call_operand.hbm [shape: f32[16,32], index: 4, kind: output, shape index: {}]  }
   0x1   :  { %10 = vsyncpa [#allocation8], 0 }
   0x2   :  { %12 = vsyncpa [#allocation8 + $0x1], 0 }
   0x3   :  { %13 = vsyncpa [#allocation11], 0 }
   0x4   :  { %14 = vsyncpa [#allocation6], 0 }
   0x5   :  { %16 = vsyncpa [#allocation6 + $0x1], 0  ;;  %s1113_s15 = smov 0   ;;  %s1115_s16 = smov 0  }
   0x6   :  { %s1117_s17 = smov 0   ;;  %s1119_s18 = smov 0  }
   0x7 LB: > { %s165_s21 = sshll.u32 %s1327_s2, 4  ;;  %s1137_s22 = sadd.s32 4294967295, %s1067_s18   ;;  %s1067_s18 = sphi %s1119_s18, %s1341_s18   ;;  %s1063_s17 = sphi %s1117_s17, %s1340_s17   ;;  %s1059_s16 = sphi %s1115_s16, %s1339_s16   ;;  %s1055_s15 = sphi %s1113_s15, %s1338_s15   ;;  %s166_s21 = int_to_ptr.hbm [resolvable:$true] %s165_s21 }
   0x8   : > { %p729_p0 = scmp.ge.s32.totalorder %s1067_s18, 1  ;;  %p64_p1 = scmp.eq.s32.totalorder %s1137_s22, 0 }
   0x9   : > { %p129_p2 = scmp.eq.s32.totalorder %s1137_s22, 1  ;;  %p142_p3 = scmp.lt.s32.totalorder %s1067_s18, 3 }
   0xa   : > { %s1069_s24 = smov [#allocation9]   ;;  %s154_s28 = sshll.u32 %s1325_s0, 4  ;;  %s155_s28 = int_to_ptr.hbm [resolvable:$true] %s154_s28 }
   0xb   : > { %p1143_p4 = pnand %p729_p0, %p142_p3  ;;  %s167_s25 = sshll.u32 %s1069_s24, 4  ;;  %s168_s25 = int_to_ptr.vmem [resolvable:$true] %s167_s25 }
   0xc   : > { %s1070_s30 = smov [#allocation4]   ;;  %s179_s8 = sshll.u32 %s1328_s3, 4  ;;  %s180_s8 = int_to_ptr.hbm [resolvable:$true] %s179_s8 }
   0xd   : > { %p776_p5 = pneg %p1143_p4  ;;  %s156_s5 = sshll.u32 %s1070_s30, 4  ;;  %s157_s5 = int_to_ptr.vmem [resolvable:$true] %s156_s5 }
   0xe   : > { %s1071_s9 = smov 128   ;;  %s1072_s10 = smov 8  }
   0xf   : > { %p1155_p7 = pnand %p776_p5, %p64_p1  ;;  %s1073_s11 = smov [#allocation10]  }
  0x10   : > { %s181_s12 = sshll.u32 %s1073_s11, 4  ;;  %s728_s13 = sadd.s32 4294967294, %s1067_s18   ;;  %s182_s12 = int_to_ptr.vmem [resolvable:$true] %s181_s12 }
  0x11   : > { %782 = dma.hbm_to_vmem [thread:$0]  (!%p1155_p7), %s166_s21, 512, %s168_s25, [#allocation8], %s1071_s9, %s1071_s9, %s1072_s10  }
  0x12   : > { %779 = dma.hbm_to_vmem [thread:$0]  (!%p1155_p7), %s155_s28, 128, %s157_s5, [#allocation5]  }
  0x13   : > { %785 = dma.hbm_to_vmem [thread:$0]  (!%p1155_p7), %s180_s8, 512, %s182_s12, [#allocation11], %s1071_s9, %s1071_s9, %s1072_s10  }
  0x14   : > { %s1170_s14 = sadd.s32 1, %s1067_s18   ;;  %s50_s20 = sadd.s32 1, %s1063_s17 }
  0x15   : > { %s47_s19 = ssub.s32 %s1067_s18, %s1170_s14  ;;  %p57_p9 = scmp.ne.s32.totalorder %s1063_s17, %s1059_s16 }
  0x16   : > { %p48_p8 = scmp.eq.s32.totalorder %s47_s19, 0  ;;  %p58_p10 = scmp.eq.s32.totalorder %s1067_s18, 0 }
  0x17   : > { %p63_p11 = scmp.ne.s32.totalorder %s1059_s16, %s1055_s15  ;;  %p1195_p0 = por %p129_p2, %p57_p9 }
  0x18   : > { %s1181_s21 = scalar_select %p48_p8, %s1063_s17, %s50_s20  }
  0x19   : > { %p1183_p12 = por %p58_p10, %p57_p9  ;;  %p1189_p13 = por %p64_p1, %p63_p11 }
  0x1a   : > { %p135_p3 = scmp.eq.s32.totalorder %s728_s13, 1  ;;  %p797_p5 = scmp.lt.s32.totalorder %s1067_s18, 2 }
  0x1b   : > { %s195_s27 = sand.u32 1, %s1067_s18   ;;  %s197_s29 = sand.u32 1, %s1063_s17  }
  0x1c   : > { %p1201_p7 = por %p135_p3, %p63_p11  ;;  %s735_s30 = sshll.u32 %s1067_s18, 3 }
  0x1d   : > { %s734_s5 = sshll.u32 %s197_s29, 3  ;;  %s203_s8 = scalar_lea.hbm %s1326_s1, %s735_s30 }
  0x1e   : > { %s205_s9 = sshll.u32 %s203_s8, 4  ;;  %s199_s10 = scalar_lea.vmem [#allocation7], %s734_s5  ;;  %s206_s9 = int_to_ptr.hbm [resolvable:$true] %s205_s9 }
  0x1f   : > { %s207_s11 = sshll.u32 %s199_s10, 4  ;;  %p1212_p2 = pnand %p797_p5, %p1183_p12  ;;  %s208_s11 = int_to_ptr.vmem [resolvable:$true] %s207_s11 }
  0x20   : > { %s196_s13 = scalar_lea.sflag [#allocation8], %s195_s27  ;;  %s959_s19 = sshra.s32 %s206_s9, 4  ;;  %s960_s19 = int_to_ptr.hbm [resolvable:$true] %s959_s19 }
  0x21   : > { %s961_s20 = scalar_lea.hbm %s960_s19, 8  ;;  %p963_p9 = pneg %p1212_p2 }
  0x22   : > { %p962_p8 = scmp.ne.s32.totalorder %s960_s19, %s961_s20  ;;  %s966_s5 = scalar_lea.hbm %s1326_s1, 16 }
  0x23   : > { %p967_p12 = scmp.lt.s32.totalorder %s960_s19, %s1326_s1  ;;  %p968_p3 = scmp.lt.s32.totalorder %s966_s5, %s961_s20 }
  0x24   : > { %p964_p10 = pnand %p963_p9, %p962_p8 }
  0x25   : > { %p969_p5 = por %p968_p3, %p967_p12 }
  0x26   : > { %p965_p11 = pneg %p964_p10 }
  0x28   : > { %p970_p6 = pnand %p969_p5, %p965_p11 }
  0x2a   : > { %973 = shalt.err (!%p970_p6)
}
  0x2b   : > { %789 = dma.hbm_to_vmem [thread:$0]  (!%p1212_p2), %s206_s9, 128, %s208_s11, %s196_s13  }
  0x2c   : > { %216 = sbr.rel (%p1143_p4) target bundleno = 1126 (0x466), region = 36 }
  0x31   : > { %1034 = dma.done.wait (%p64_p1), [#allocation5], 128  }
  0x32   : > { %1036 = vsyncadd (%p64_p1), [#allocation5], 4294967168  ;;  %s223_s27 = sand.u32 1, %s1137_s22   ;;  %s225_s7 = sand.u32 1, %s1059_s16  }
  0x33   : > { %s1236_s8 = sshll.u32 %s225_s7, 3  ;;  %s224_s9 = scalar_lea.sflag [#allocation8], %s223_s27 }
  0x34   : > { %s227_s10 = scalar_lea.vmem [#allocation7], %s1236_s8 }
  0x35   : > { %1038 = dma.done.wait (%p1189_p13), %s224_s9, 128  }
  0x36   : > { %1040 = vsyncadd (%p1189_p13), %s224_s9, 4294967168 }
  0x37   : > { %1042 = dma.done.wait (%p64_p1), [#allocation8], 512  }
  0x38   : > { %1044 = vsyncadd (%p64_p1), [#allocation8], 4294966784 }
  0x39   : > { %1046 = dma.done.wait (%p64_p1), [#allocation11], 512  }
  0x3a   : > { %1048 = vsyncadd (%p64_p1), [#allocation11], 4294966784  ;;  %v267_v0 = vld [vmem:[#allocation9 + $0x18] sm:$0xff]  ;;  %v266_v1 = vld [vmem:[#allocation9 + $0x10] sm:$0xff]  ;;  %vm268_vm0 = vcmask 261120   ;;  %vm292_vm1 = vcmask 785408  }
  0x3b   : > { %284 = vmatpush.msra.mxu0 %v267_v0  ;;  %v265_v2 = vld [vmem:[#allocation9 + $0x8] sm:$0xff]  ;;  %v264_v3 = vld [vmem:[#allocation9] sm:$0xff]  ;;  %v263_v4 = vld [vmem:[%s227_s10] sm:$0xff]  ;;  %s1074_s23 = smov 72   ;;  %s1075_s25 = smov 120   ;;  %vm299_vm2 = vcmask 64512  }
  0x3c   : > { %s1076_s11 = smov 96   ;;  %s1077_s12 = smov 112   ;;  %v294_v15 = vld [vmem:[#allocation4] sm:$0xff]  ;;  %vm577_vm3 = vcmask 130048   ;;  %vm579_vm4 = vcmask 195584  }
  0x3d   : > { %285 = vmatpush.msra.mxu0 %v266_v1  ;;  %s1078_s13 = smov 80   ;;  %s1079_s19 = smov 88  }
  0x3e   : > { %s1080_s20 = smov 104   ;;  %s1081_s29 = smov 64  }
  0x3f   : > { %286 = vmatpush.msra.mxu0 %v265_v2  ;;  %s1082_s30 = smov 40   ;;  %s1083_s5 = smov 56  }
  0x40   : > { %s1084_s6 = smov 48   ;;  %s1085_s24 = smov 16  }
  0x41   : > { %287 = vmatpush.msra.mxu0 %v264_v3  ;;  %s1086_s27 = smov 8   ;;  %s1087_s9 = smov 24  }
  0x42   : > { %742 = vmatmul.msk.f32.vlgmr.msra.gmra.mxu0 %vm268_vm0, %v263_v4  ;;  %s757_s10 = sshll.u32 %s1137_s22, 3 }
  0xbf   : > { %v289_v5 = vpop.f32.mrf.mxu0 }
  0xc0   : > { %293 = vst.msk [vmem:[#allocation2] sm:$0xff] %vm292_vm1, %v289_v5 }
  0xc7   : > { %v1252_v6 = vld [vmem:[#allocation2] sm:$0xff] }
  0xc8   : > { %499 = vrot.lane.b32.xlu2 %v1252_v6, %s1074_s23  ;;  %363 = vrot.lane.b32.xlu1 %v1252_v6, %s1075_s25 }
  0xc9   : > { %297 = vrot.lane.b32.xlu0 %v1252_v6, %s1076_s11  ;;  %s622_s11 = scalar_lea.hbm %s1329_s4, %s757_s10 }
  0xd0   : > { %430 = vrot.lane.b32.xlu2 %v1252_v6, %s1077_s12  ;;  %432 = vrot.lane.b32.xlu1 %v1252_v6, %s1078_s13  ;;  %s262_s12 = scalar_lea.vmem [#allocation12], %s1236_s8  ;;  %s1009_s8 = scalar_lea.hbm %s1329_s4, 16 }
  0xd1   : > { %365 = vrot.lane.b32.xlu0 %v1252_v6, %s1079_s19  ;;  %s624_s13 = sshll.u32 %s262_s12, 4  ;;  %s626_s19 = sshll.u32 %s622_s11, 4  ;;  %s625_s13 = int_to_ptr.vmem [resolvable:$true] %s624_s13  ;;  %s627_s19 = int_to_ptr.hbm [resolvable:$true] %s626_s19 }
  0xd9   : > { %497 = vrot.lane.b32.xlu0 %v1252_v6, %s1080_s20  ;;  %s612_s20 = scalar_lea.sflag [#allocation6], %s225_s7 }
 0x122   : > { %v500_v7 = vpop.permute.xlu2 %499 }
 0x123   : > { %752 = vmatpush.xpose.msk.msrb.mxu0 %vm299_vm2, %v500_v7  ;;  %v586_v7 = vld [vmem:[#allocation10 + $0x18] sm:$0xff] }
 0x12a   : > { %v431_v12 = vpop.permute.xlu2 %430 }
 0x13a   : > { %v364_v8 = vpop.permute.xlu1 %363 }
 0x13b   : > { %v298_v9 = vpop.permute.xlu0 %297 }
 0x13c   : > { %743 = vmatpush.xpose.msk.msra.mxu1 %vm299_vm2, %v298_v9  ;;  %v584_v9 = vld [vmem:[#allocation10 + $0x8] sm:$0xff] }
 0x13f   : > { %744 = vmatmul.msk.f32.vlgmr.msra.gmra.mxu1 %vm299_vm2, %v1252_v6 }
 0x142   : > { %v433_v10 = vpop.permute.xlu1 %432 }
 0x143   : > { %v366_v11 = vpop.permute.xlu0 %365  ;;  %749 = vmatpush.xpose.msk.msrb.mxu1 %vm299_vm2, %v433_v10  ;;  %v583_v10 = vld [vmem:[#allocation10] sm:$0xff] }
 0x144   : > { %746 = vmatpush.xpose.msk.msra.mxu3 %vm299_vm2, %v366_v11 }
 0x147   : > { %747 = vmatmul.msk.f32.vlgmr.msra.gmra.mxu3 %vm299_vm2, %v364_v8  ;;  %750 = vmatmul.msk.f32.vlgmr.msrb.gmra.mxu1 %vm299_vm2, %v431_v12  ;;  %v585_v8 = vld [vmem:[#allocation10 + $0x10] sm:$0xff] }
 0x148   : > { %602 = vmatpush.msra.mxu1 %v586_v7 }
 0x14a   : > { %603 = vmatpush.msra.mxu1 %v585_v8 }
 0x14b   : > { %v498_v13 = vpop.permute.xlu0 %497 }
 0x14c   : > { %753 = vmatmul.msk.f32.vlgmr.msrb.gmra.mxu0 %vm299_vm2, %v498_v13  ;;  %604 = vmatpush.msra.mxu1 %v584_v9 }
 0x14e   : > { %605 = vmatpush.msra.mxu1 %v583_v10 }
 0x1bc   : > { %v321_v14 = vpop.f32.mrf.mxu1 }
 0x1bd   : > { %v324_v16 = vmul.f32 0.35355338, %v321_v14 }
 0x1bf   : > { %v325_v17 = vadd.f32 %v324_v16, %v294_v15 }
 0x1c1   : > { %v326_v18 = vsel %vm299_vm2, %v325_v17, -inf }
 0x1c2   : > { %327 = vmax.xlane.f32.xlu1 %v326_v18 }
 0x1c4   : > { %v455_v19 = vpop.f32.mrf.mxu1 }
 0x1c5   : > { %v458_v20 = vmul.f32 0.35355338, %v455_v19 }
 0x1c7   : > { %v459_v21 = vadd.f32 %v458_v20, %v294_v15 }
 0x1c9   : > { %v460_v22 = vsel %vm299_vm2, %v459_v21, -inf  ;;  %v522_v25 = vpop.f32.mrf.mxu0 }
 0x1ca   : > { %461 = vmax.xlane.f32.xlu0 %v460_v22  ;;  %v388_v23 = vpop.f32.mrf.mxu3  ;;  %v525_v27 = vmul.f32 0.35355338, %v522_v25 }
 0x1cb   : > { %v391_v24 = vmul.f32 0.35355338, %v388_v23 }
 0x1cc   : > { %v526_v29 = vadd.f32 %v525_v27, %v294_v15 }
 0x1cd   : > { %v392_v26 = vadd.f32 %v391_v24, %v294_v15 }
 0x1ce   : > { %v527_v30 = vsel %vm299_vm2, %v526_v29, -inf }
 0x1cf   : > { %v393_v28 = vsel %vm299_vm2, %v392_v26, -inf }
 0x1d0   : > { %394 = vmax.xlane.f32.xlu2 %v393_v28 }
 0x1d8   : > { %528 = vmax.xlane.f32.xlu2 %v527_v30 }
 0x1de   : > { %337 = vrot.lane.b32.xlu0 %v1252_v6, %s1081_s29  ;;  %s1003_s29 = sshra.s32 %s627_s19, 4  ;;  %s1004_s29 = int_to_ptr.hbm [resolvable:$true] %s1003_s29 }
 0x1df   : > { %p1010_p13 = scmp.lt.s32.totalorder %s1004_s29, %s1329_s4 }
 0x1e6   : > { %538 = vrot.lane.b32.xlu0 %v1252_v6, %s1082_s30  ;;  %s1005_s30 = scalar_lea.hbm %s1004_s29, 8 }
 0x1e7   : > { %p1006_p1 = scmp.ne.s32.totalorder %s1004_s29, %s1005_s30  ;;  %p1011_p2 = scmp.lt.s32.totalorder %s1009_s8, %s1005_s30 }
 0x1e9   : > { %p1007_p4 = pnand %p1006_p1, %p1195_p0  ;;  %p1012_p8 = por %p1011_p2, %p1010_p13 }
 0x1eb   : > { %p1008_p6 = pneg %p1007_p4 }
 0x1ed   : > { %p1013_p9 = pnand %p1012_p8, %p1008_p6 }
 0x235   : > { %v328_v31 = vpop.xlane.xlu1 %327 }
 0x236   : > { %v329_v32 = vsub.f32 %v325_v17, %v328_v31 }
 0x238   : > { %v330_v33 = vmul.f32 1.442695, %v329_v32 }
 0x23a   : > { %853 = vpow2.f32 %v330_v33 }
 0x23d   : > { %v462_v34 = vpop.xlane.xlu0 %461 }
 0x23e   : > { %v463_v35 = vsub.f32 %v459_v21, %v462_v34 }
 0x240   : > { %v854_v36 = vpop.eup %853  ;;  %v464_v37 = vmul.f32 1.442695, %v463_v35 }
 0x241   : > { %v332_v38 = vsel %vm299_vm2, %v854_v36, 0.0 }
 0x242   : > { %855 = vpow2.f32 %v464_v37  ;;  %333 = vadd.xlane.f32.xlu1 %v332_v38 }
 0x243   : > { %v395_v39 = vpop.xlane.xlu2 %394 }
 0x244   : > { %v396_v44 = vsub.f32 %v392_v26, %v395_v39 }
 0x246   : > { %v397_v47 = vmul.f32 1.442695, %v396_v44 }
 0x248   : > { %v856_v40 = vpop.eup %855 }
 0x249   : > { %v466_v41 = vsel %vm299_vm2, %v856_v40, 0.0 }
 0x24a   : > { %467 = vadd.xlane.f32.xlu1 %v466_v41 }
 0x24b   : > { %v529_v42 = vpop.xlane.xlu2 %528 }
 0x24c   : > { %v530_v43 = vsub.f32 %v526_v29, %v529_v42 }
 0x24e   : > { %v531_v45 = vmul.f32 1.442695, %v530_v43 }
 0x250   : > { %857 = vpow2.f32 %v531_v45  ;;  %v338_v46 = vpop.permute.xlu0 %337 }
 0x251   : > { %358 = vmatpush.msra.mxu2 %v338_v46  ;;  %859 = vpow2.f32 %v397_v47 }
 0x256   : > { %v858_v48 = vpop.eup %857 }
 0x257   : > { %v533_v49 = vsel %vm299_vm2, %v858_v48, 0.0  ;;  %v860_v50 = vpop.eup %859 }
 0x258   : > { %534 = vadd.xlane.f32.xlu2 %v533_v49  ;;  %v399_v51 = vsel %vm299_vm2, %v860_v50, 0.0  ;;  %v539_v59 = vpop.permute.xlu0 %538 }
 0x260   : > { %400 = vadd.xlane.f32.xlu2 %v399_v51 }
 0x263   : > { %404 = vrot.lane.b32.xlu1 %v1252_v6, %s1083_s5 }
 0x278   : > { %471 = vrot.lane.b32.xlu2 %v1252_v6, %s1084_s6 }
 0x2b5   : > { %v334_v52 = vpop.xlane.xlu1 %333 }
 0x2b6   : > { %861 = vrcp.f32 %v334_v52 }
 0x2bc   : > { %v862_v53 = vpop.eup %861 }
 0x2bd   : > { %v336_v54 = vmul.f32 %v862_v53, %v854_v36  ;;  %v468_v56 = vpop.xlane.xlu1 %467 }
 0x2be   : > { %863 = vrcp.f32 %v468_v56 }
 0x2bf   : > { %745 = vmatmul.msk.f32.vlgmr.msra.gmra.mxu2 %vm299_vm2, %v336_v54 }
 0x2c4   : > { %v864_v60 = vpop.eup %863 }
 0x2c5   : > { %v470_v0 = vmul.f32 %v864_v60, %v856_v40 }
 0x2cb   : > { %v535_v55 = vpop.xlane.xlu2 %534 }
 0x2d3   : > { %v401_v57 = vpop.xlane.xlu2 %400 }
 0x2d4   : > { %865 = vrcp.f32 %v401_v57 }
 0x2d5   : > { %v405_v58 = vpop.permute.xlu1 %404  ;;  %867 = vrcp.f32 %v535_v55 }
 0x2d6   : > { %425 = vmatpush.msrb.mxu2 %v405_v58 }
 0x2d8   : > { %559 = vmatpush.msra.mxu2 %v539_v59 }
 0x2da   : > { %v866_v61 = vpop.eup %865 }
 0x2db   : > { %v472_v62 = vpop.permute.xlu2 %471  ;;  %v403_v63 = vmul.f32 %v866_v61, %v860_v50  ;;  %v868_v1 = vpop.eup %867 }
 0x2dc   : > { %492 = vmatpush.msrb.mxu3 %v472_v62  ;;  %v537_v2 = vmul.f32 %v868_v1, %v858_v48 }
 0x2dd   : > { %748 = vmatmul.msk.f32.vlgmr.msrb.gmra.mxu2 %vm299_vm2, %v403_v63  ;;  %751 = vmatmul.msk.f32.vlgmr.msrb.gmra.mxu3 %vm299_vm2, %v470_v0 }
 0x2e5   : > { %754 = vmatmul.msk.f32.vlgmr.msra.gmra.mxu2 %vm299_vm2, %v537_v2 }
 0x342   : > { %v360_v3 = vpop.f32.mrf.mxu2 }
 0x360   : > { %v427_v4 = vpop.f32.mrf.mxu2  ;;  %v494_v5 = vpop.f32.mrf.mxu3 }
 0x361   : > { %569 = vrot.lane.b32.xlu1 %v494_v5, %s1085_s24  ;;  %565 = vrot.lane.b32.xlu0 %v427_v4, %s1086_s27 }
 0x368   : > { %v561_v6 = vpop.f32.mrf.mxu2 }
 0x369   : > { %573 = vrot.lane.b32.xlu0 %v561_v6, %s1087_s9 }
 0x3d3   : > { %v566_v11 = vpop.permute.xlu0 %565  ;;  %v570_v12 = vpop.permute.xlu1 %569 }
 0x3d4   : > { %v576_v13 = vsel %vm299_vm2, %v360_v3, %v566_v11 }
 0x3d5   : > { %v578_v14 = vsel %vm577_vm3, %v576_v13, %v570_v12 }
 0x3db   : > { %v574_v15 = vpop.permute.xlu0 %573 }
 0x3dc   : > { %v580_v16 = vsel %vm579_vm4, %v578_v14, %v574_v15 }
 0x3dd   : > { %581 = vst.msk [vmem:[#allocation3] sm:$0xff] %vm268_vm0, %v580_v16 }
 0x3e4   : > { %v582_v17 = vld [vmem:[#allocation3] sm:$0xff] }
 0x3e5   : > { %755 = vmatmul.msk.f32.vlgmr.msra.gmra.mxu1 %vm268_vm0, %v582_v17 }
 0x462   : > { %v607_v18 = vpop.f32.mrf.mxu1 }
 0x463   : > { %610 = vst.msk [vmem:[%s262_s12] sm:$0xff] %vm268_vm0, %v607_v18 }
 0x464   : > { %1016 = shalt.err (!%p1013_p9)
}
 0x465   : > { %774 = dma.vmem_to_hbm [thread:$0]  (%p1195_p0), %s625_s13, 128, %s627_s19, %s612_s20  }
 0x466 PF: > { %s638_s7 = sand.u32 1, %s1055_s15   ;;  %p1337_p10 = scmp.ge.s32.totalorder %s1067_s18, 2 }
 0x467   : > { %s639_s27 = scalar_lea.sflag [#allocation6], %s638_s7 }
 0x468   : > { %p791_p11 = pnand %p1337_p10, %p1201_p7 }
 0x46a   : > { %p792_p12 = pneg %p791_p11 }
 0x46c   : > { %1050 = dma.done.wait (%p792_p12), %s639_s27, 128  }
 0x46d   : > { %1052 = vsyncadd (%p792_p12), %s639_s27, 4294967168  ;;  %p19_p3 = scmp.ge.s32.totalorder %s1170_s14, 4   ;;  %s1338_s15 = smov %s1059_s16 }
 0x46e   : > { %s1339_s16 = smov %s1063_s17  ;;  %s1340_s17 = smov %s1181_s21 }
 0x46f   : > { %s1341_s18 = smov %s1170_s14  ;;  %21 = sbr.rel (!%p19_p3) target bundleno = 7 (0x7), region = 94 }
 0x474   :  { %645 = vsyncpa [#allocation5], 1 }
 0x475   :  { %647 = vsyncpa [#allocation5 + $0x1], 1 }
 0x476   :  { %648 = vsyncpa [#allocation8], 1 }
 0x477   :  { %650 = vsyncpa [#allocation8 + $0x1], 1 }
 0x478   :  { %651 = vsyncpa [#allocation11], 1 }
 0x479   :  { %652 = vsyncpa [#allocation6], 1 }
 0x47a   :  { %654 = vsyncpa [#allocation6 + $0x1], 1 }

</bundles_post_ra>
